<compile_context>
chip_gen: v7x
topology: tpu7x:2x2x1
jax: 0.10.0
libtpu: 0.0.40
codegen_flags: <defaults>
</compile_context>

<pallas_src>
import functools

import jax
import jax.numpy as jnp
import numpy as np
from jax.experimental import pallas as pl
from jax.experimental.pallas import tpu as pltpu


def _masked_loss_tile_kernel(pred_ref, tgt_ref, mask_ref, out_ref, *,
                             batch_size, tile_rows):
    step = pl.program_id(0)

    logits = pred_ref[...].astype(jnp.float32)                          # (TB, C)
    tb, c = logits.shape

    # --- per-row cross-entropy:  loss_i = logsumexp(x_i) - x_i[target_i] ---
    row_max = jnp.max(logits, axis=-1, keepdims=True)                   # (TB, 1)
    lse = row_max + jnp.log(
        jnp.sum(jnp.exp(logits - row_max), axis=-1, keepdims=True))     # (TB, 1)

    tgt = tgt_ref[...]                                                  # (TB, 1) int32
    class_ids = jax.lax.broadcasted_iota(jnp.int32, (tb, c), 1)         # (TB, C)
    tgt_logit = jnp.sum(jnp.where(class_ids == tgt, logits, 0.0),
                        axis=-1, keepdims=True)                         # (TB, 1)

    loss = lse - tgt_logit                                              # (TB, 1)

    # --- zero out padded rows of the last (partial) tile ----------------
    row_ids = jax.lax.broadcasted_iota(jnp.int32, (tb, 1), 0) + step * tile_rows
    valid = (row_ids < batch_size).astype(jnp.float32)                  # (TB, 1)
    loss = loss * valid

    # --- per-tile partial sums ------------------------------------------
    mask = mask_ref[...].astype(jnp.float32)                            # (TB, 1)
    s_masked = jnp.sum(loss * mask)   # sum over valid rows of loss * mask
    s_total = jnp.sum(loss)           # sum over valid rows of loss

    # lane-dense (1, 1, 128) partial output: [s_masked, s_total, 0, ...]
    lane = jax.lax.broadcasted_iota(jnp.int32, (1, 1, 128), 2)
    out_ref[...] = jnp.where(lane == 0, s_masked,
                             jnp.where(lane == 1, s_total, 0.0))


def _choose_tile_rows(B, C, itemsize):
    """Pick TB so the double-buffered predictions tile stays ~<= 8 MiB VMEM."""
    budget_bytes = 4 * 1024 * 1024               # per-buffer predictions budget
    tb = budget_bytes // max(1, C * itemsize)
    tb = min(tb, 1024)
    if tb >= B:
        # single tile: just round the batch up to the sublane multiple
        return max(8, -(-B // 8) * 8)
    return max(8, (tb // 8) * 8)


def masked_loss(predictions, targets, mask=None, alpha=1.0 / 6.0, *,
                tile_rows=None, force_pallas=False):
    """JAX/Pallas equivalent of MaskedLoss.forward.

    predictions: (B, C) float (f32 or bf16)
    targets:     (B,)   int
    mask:        (B,)   float or None
    returns scalar float32 loss.
    """
    B, C = predictions.shape
    itemsize = jnp.dtype(predictions.dtype).itemsize

    if mask is None:
        # mask == ones: masked.mean() == loss.mean(), unmasked term == 0,
        # matching the PyTorch `mask is None` branch exactly.
        mask = jnp.ones((B,), jnp.float32)

    # Tiny problems: pallas_call launch overhead dominates; let XLA fuse it.
    if not force_pallas and B * C * itemsize < (1 << 16):
        return _reference_masked_loss(predictions, targets, mask, alpha)

    if tile_rows is None:
        tb = _choose_tile_rows(B, C, itemsize)
    else:
        tb = max(8, (int(tile_rows) // 8) * 8)

    num_tiles = -(-B // tb)
    b_pad = num_tiles * tb
    pad = b_pad - B

    pred_p = jnp.pad(predictions, ((0, pad), (0, 0)))
    tgt_p = jnp.pad(targets.astype(jnp.int32), (0, pad)).reshape(b_pad, 1)
    mask_p = jnp.pad(mask.astype(jnp.float32), (0, pad)).reshape(b_pad, 1)

    kernel = functools.partial(_masked_loss_tile_kernel,
                               batch_size=B, tile_rows=tb)

    partials = pl.pallas_call(
        kernel,
        out_shape=jax.ShapeDtypeStruct((num_tiles, 1, 128), jnp.float32),
        grid=(num_tiles,),
        in_specs=[
            pl.BlockSpec((tb, C), lambda i: (i, 0)),
            pl.BlockSpec((tb, 1), lambda i: (i, 0)),
            pl.BlockSpec((tb, 1), lambda i: (i, 0)),
        ],
        out_specs=pl.BlockSpec((1, 1, 128), lambda i: (i, 0, 0)),
        compiler_params=pltpu.CompilerParams(
            dimension_semantics=("parallel",),
            vmem_limit_bytes=32 * 1024 * 1024),
    )(pred_p, tgt_p, mask_p)

    s_masked = jnp.sum(partials[:, 0, 0])
    s_total = jnp.sum(partials[:, 0, 1])
    s_unmasked = s_total - s_masked
    return s_masked / B + alpha * (s_unmasked / B)


def _reference_masked_loss(predictions, targets, mask=None, alpha=1.0 / 6.0):
    logits = predictions.astype(jnp.float32)
    lse = jax.scipy.special.logsumexp(logits, axis=-1)
    tgt_logit = jnp.take_along_axis(
        logits, targets.astype(jnp.int32)[:, None], axis=-1)[:, 0]
    loss = lse - tgt_logit
    if mask is None:
        return loss.mean()
    mask = mask.astype(jnp.float32)
    return (loss * mask).mean() + alpha * (loss * (1.0 - mask)).mean()


if __name__ == "__main__":
    key = jax.random.PRNGKey(0)
    k1, k2, k3, k4, k5, k6 = jax.random.split(key, 6)

    # --- small shape (module's natural scale), kernel forced on ----------
    B, C = 8, 32
    predictions = jax.random.normal(k1, (B, C), dtype=jnp.float32)
    targets = jax.random.randint(k2, (B,), 0, C, dtype=jnp.int32)
    mask = (jax.random.uniform(k3, (B,)) > 0.5).astype(jnp.float32)

    out_masked = masked_loss(predictions, targets, mask, force_pallas=True)
    jax.block_until_ready(out_masked)
    ref_masked = _reference_masked_loss(predictions, targets, mask)
    assert np.allclose(np.asarray(out_masked), np.asarray(ref_masked),
                       rtol=1e-5, atol=1e-5)

    out_plain = masked_loss(predictions, targets, None, force_pallas=True)
    jax.block_until_ready(out_plain)
    ref_plain = _reference_masked_loss(predictions, targets, None)
    assert np.allclose(np.asarray(out_plain), np.asarray(ref_plain),
                       rtol=1e-5, atol=1e-5)

    # --- multi-tile + padded-last-tile path (B not a multiple of TB) -----
    B2, C2 = 300, 40
    pred2 = jax.random.normal(k4, (B2, C2), dtype=jnp.float32)
    tgt2 = jax.random.randint(k5, (B2,), 0, C2, dtype=jnp.int32)
    mask2 = (jax.random.uniform(k6, (B2,)) > 0.3).astype(jnp.float32)

    out2 = masked_loss(pred2, tgt2, mask2, tile_rows=128, force_pallas=True)
    jax.block_until_ready(out2)
    ref2 = _reference_masked_loss(pred2, tgt2, mask2)
    assert np.allclose(np.asarray(out2), np.asarray(ref2),
                       rtol=1e-5, atol=1e-5)

    # --- bf16 predictions (half the HBM bytes; upcast happens in-kernel) -
    pred_bf16 = pred2.astype(jnp.bfloat16)
    out_bf16 = masked_loss(pred_bf16, tgt2, mask2, tile_rows=128,
                           force_pallas=True)
    jax.block_until_ready(out_bf16)
    ref_bf16 = _reference_masked_loss(pred_bf16, tgt2, mask2)
    assert np.allclose(np.asarray(out_bf16), np.asarray(ref_bf16),
                       rtol=1e-4, atol=1e-4)

    print("KERNEL_OK")
</pallas_src>

<mosaic_0001>
module attributes {stable_mosaic.version = 11 : i64} {
  func.func @_masked_loss_tile_kernel(%arg0: i32, %arg1: memref<8x32xf32, #tpu.memory_space<vmem>>, %arg2: memref<8x1xi32, #tpu.memory_space<vmem>>, %arg3: memref<8x1xf32, #tpu.memory_space<vmem>>, %arg4: memref<1x1x128xf32, #tpu.memory_space<vmem>>) attributes {dimension_semantics = [#tpu.dimension_semantics<parallel>], iteration_bounds = array<i64: 1>, scalar_prefetch = 0 : i64, scratch_operands = 0 : i64, tpu.core_type = #tpu.core_type<tc>, window_params = [{transform_indices = @transform_0, window_bounds = array<i64: 8, 32>}, {transform_indices = @transform_1, window_bounds = array<i64: 8, 1>}, {transform_indices = @transform_2, window_bounds = array<i64: 8, 1>}, {transform_indices = @transform_3, window_bounds = array<i64: 1, 1, 128>}]} {
    %c0 = arith.constant 0 : index
    %c0_0 = arith.constant 0 : index
    %0 = vector.load %arg1[%c0, %c0_0] : memref<8x32xf32, #tpu.memory_space<vmem>>, vector<8x32xf32>
    %cst = arith.constant dense<0xFF800000> : vector<8xf32>
    %1 = vector.multi_reduction <maximumf>, %0, %cst [1] : vector<8x32xf32> to vector<8xf32>
    %2 = vector.shape_cast %1 : vector<8xf32> to vector<8x1xf32>
    %3 = vector.broadcast %2 : vector<8x1xf32> to vector<8x32xf32>
    %4 = arith.subf %0, %3 : vector<8x32xf32>
    %5 = math.exp %4 : vector<8x32xf32>
    %cst_1 = arith.constant dense<0.000000e+00> : vector<8xf32>
    %6 = vector.multi_reduction <add>, %5, %cst_1 [1] : vector<8x32xf32> to vector<8xf32>
    %7 = vector.shape_cast %6 : vector<8xf32> to vector<8x1xf32>
    %8 = math.log %7 : vector<8x1xf32>
    %9 = arith.addf %2, %8 : vector<8x1xf32>
    %c0_2 = arith.constant 0 : index
    %c0_3 = arith.constant 0 : index
    %10 = vector.load %arg2[%c0_2, %c0_3] : memref<8x1xi32, #tpu.memory_space<vmem>>, vector<8x1xi32>
    %11 = tpu.iota {dimensions = array<i32: 1>} : vector<8x32xi32>
    %12 = vector.broadcast %10 : vector<8x1xi32> to vector<8x32xi32>
    %13 = arith.cmpi eq, %11, %12 : vector<8x32xi32>
    %cst_4 = arith.constant 0.000000e+00 : f32
    %14 = vector.broadcast %cst_4 : f32 to vector<8x32xf32>
    %15 = arith.select %13, %0, %14 : vector<8x32xi1>, vector<8x32xf32>
    %cst_5 = arith.constant dense<0.000000e+00> : vector<8xf32>
    %16 = vector.multi_reduction <add>, %15, %cst_5 [1] : vector<8x32xf32> to vector<8xf32>
    %17 = vector.shape_cast %16 : vector<8xf32> to vector<8x1xf32>
    %18 = arith.subf %9, %17 : vector<8x1xf32>
    %19 = tpu.iota {dimensions = array<i32: 0>} : vector<8x1xi32>
    %c8_i32 = arith.constant 8 : i32
    %20 = arith.muli %arg0, %c8_i32 : i32
    %21 = vector.broadcast %20 : i32 to vector<8x1xi32>
    %22 = arith.addi %19, %21 : vector<8x1xi32>
    %c8_i32_6 = arith.constant 8 : i32
    %23 = vector.broadcast %c8_i32_6 : i32 to vector<8x1xi32>
    %24 = arith.cmpi slt, %22, %23 : vector<8x1xi32>
    %25 = arith.extui %24 : vector<8x1xi1> to vector<8x1xi32>
    %26 = arith.sitofp %25 : vector<8x1xi32> to vector<8x1xf32>
    %27 = arith.mulf %18, %26 : vector<8x1xf32>
    %c0_7 = arith.constant 0 : index
    %c0_8 = arith.constant 0 : index
    %28 = vector.load %arg3[%c0_7, %c0_8] : memref<8x1xf32, #tpu.memory_space<vmem>>, vector<8x1xf32>
    %29 = arith.mulf %27, %28 : vector<8x1xf32>
    %30 = vector.shape_cast %29 : vector<8x1xf32> to vector<1x8x1xf32>
    %cst_9 = arith.constant dense<0.000000e+00> : vector<1xf32>
    %31 = vector.multi_reduction <add>, %30, %cst_9 [1, 2] : vector<1x8x1xf32> to vector<1xf32>
    %32 = vector.shape_cast %31 : vector<1xf32> to vector<1x1x1xf32>
    %33 = vector.extract %32[0, 0, 0] : f32 from vector<1x1x1xf32>
    %34 = vector.shape_cast %27 : vector<8x1xf32> to vector<1x8x1xf32>
    %cst_10 = arith.constant dense<0.000000e+00> : vector<1xf32>
    %35 = vector.multi_reduction <add>, %34, %cst_10 [1, 2] : vector<1x8x1xf32> to vector<1xf32>
    %36 = vector.shape_cast %35 : vector<1xf32> to vector<1x1x1xf32>
    %37 = vector.extract %36[0, 0, 0] : f32 from vector<1x1x1xf32>
    %38 = tpu.iota {dimensions = array<i32: 2>} : vector<1x1x128xi32>
    %c0_i32 = arith.constant 0 : i32
    %39 = vector.broadcast %c0_i32 : i32 to vector<1x1x128xi32>
    %40 = arith.cmpi eq, %38, %39 : vector<1x1x128xi32>
    %c1_i32 = arith.constant 1 : i32
    %41 = vector.broadcast %c1_i32 : i32 to vector<1x1x128xi32>
    %42 = arith.cmpi eq, %38, %41 : vector<1x1x128xi32>
    %cst_11 = arith.constant 0.000000e+00 : f32
    %43 = vector.broadcast %37 : f32 to vector<1x1x128xf32>
    %44 = vector.broadcast %cst_11 : f32 to vector<1x1x128xf32>
    %45 = arith.select %42, %43, %44 : vector<1x1x128xi1>, vector<1x1x128xf32>
    %46 = vector.broadcast %33 : f32 to vector<1x1x128xf32>
    %47 = arith.select %40, %46, %45 : vector<1x1x128xi1>, vector<1x1x128xf32>
    %c0_12 = arith.constant 0 : index
    %c0_13 = arith.constant 0 : index
    %c0_14 = arith.constant 0 : index
    %48 = vector.load %arg4[%c0_12, %c0_13, %c0_14] : memref<1x1x128xf32, #tpu.memory_space<vmem>>, vector<1x1x128xf32>
    tpu.vector_store %arg4[%c0_12, %c0_13, %c0_14], %47 {strides = array<i32>} : memref<1x1x128xf32, #tpu.memory_space<vmem>>, vector<1x1x128xf32>,
    return
  }
  func.func @transform_0(%arg0: i32) -> (i32, i32) {
    %c0_i32 = arith.constant 0 : i32
    %c0_i32_0 = arith.constant 0 : i32
    return %arg0, %c0_i32 : i32, i32
  }
  func.func @transform_1(%arg0: i32) -> (i32, i32) {
    %c0_i32 = arith.constant 0 : i32
    %c0_i32_0 = arith.constant 0 : i32
    return %arg0, %c0_i32 : i32, i32
  }
  func.func @transform_2(%arg0: i32) -> (i32, i32) {
    %c0_i32 = arith.constant 0 : i32
    %c0_i32_0 = arith.constant 0 : i32
    return %arg0, %c0_i32 : i32, i32
  }
  func.func @transform_3(%arg0: i32) -> (i32, i32, i32) {
    %c0_i32 = arith.constant 0 : i32
    %c0_i32_0 = arith.constant 0 : i32
    %c0_i32_1 = arith.constant 0 : i32
    return %arg0, %c0_i32, %c0_i32_0 : i32, i32, i32
  }
}

</mosaic_0001>

<bundles_post_ra>
// kernel: tpu_custom_call.1
= control target key start
LH: loop header
LB: loop body
LE: loop exit
PB: predicated region body
PF: predicated region fallthrough
CT: control target
= control target key end

     0   :  { %vm16_vm0 = vcmask 261120   ;;  %s175_s0 = inlined_call_operand.vmem [shape: f32[8,32], index: 0, kind: input, shape index: {}]   ;;  %s176_s1 = inlined_call_operand.vmem [shape: s32[8,1], index: 1, kind: input, shape index: {}]   ;;  %s177_s2 = inlined_call_operand.vmem [shape: f32[8,1], index: 2, kind: input, shape index: {}]   ;;  %s178_s3 = inlined_call_operand.hbm [shape: f32[1,1,128], index: 3, kind: output, shape index: {}]  }
   0x1   :  { %v15_v0 = vld [vmem:[%s175_s0] sm:$0xff] }
   0x2   :  { %8 = vsyncpa [#allocation3], 0  ;;  %v17_v1 = vsel %vm16_vm0, %v15_v0, -inf  ;;  %v129_v2 = vmov 0   ;;  %v29_v3 = vld [vmem:[%s176_s1] sm:$0xff]  ;;  %v30_v7 = vlaneseq  ;;  %vm52_vm2 = vcmask 7168  }
   0x3   :  { %100 = vset.pattern.permute.xlu0 %v129_v2  ;;  %v50_v19 = vld [vmem:[%s177_s2] sm:$0xff]  ;;  %s130_s16 = smov [#allocation2]  }
   0x4   :  { %18 = vmax.xlane.f32.xlu0 %v17_v1  ;;  %v31_v8 = vand.u32 127, %v30_v7  ;;  %s86_s17 = sshll.u32 %s130_s16, 4  ;;  %s87_s17 = int_to_ptr.vmem [resolvable:$true] %s86_s17 }
   0x5   :  { %s105_s19 = scalar_lea.vmem %s87_s17, 16  ;;  %s109_s20 = scalar_lea.vmem %s87_s17, 32 }
   0x6   :  { %vm74_vm3 = vcmp.eq.s32.totalorder %v31_v8, 1  ;;  %vm73_vm4 = vcmp.eq.s32.totalorder %v31_v8, 0  ;;  %p106_p0 = scmp.ne.s32.totalorder %s87_s17, %s105_s19  ;;  %p110_p1 = scmp.lt.s32.totalorder %s87_s17, %s87_s17 }
   0x7   :  { %p111_p2 = scmp.lt.s32.totalorder %s109_s20, %s105_s19 }
   0x9   :  { %p112_p3 = por %p111_p2, %p110_p1 }
   0xb   :  { %p113_p4 = pnand %p112_p3, %p106_p0 }
  0x1a   :  { %33 = vperm.xlu0 %100, %v29_v3  }
  0x91   :  { %v19_v4 = vpop.xlane.xlu0 %18 }
  0x92   :  { %v20_v5 = vsub.f32 %v15_v0, %v19_v4 }
  0x94   :  { %v21_v6 = vmul.f32 1.442695, %v20_v5 }
  0x96   :  { %101 = vpow2.f32 %v21_v6 }
  0x99   :  { %v34_v9 = vpop.permute.xlu0 %33 }
  0x9a   :  { %vm35_vm1 = vcmp.eq.s32.totalorder %v31_v8, %v34_v9 }
  0x9b   :  { %v36_v11 = vsel %vm35_vm1, %v15_v0, 0.0 }
  0x9c   :  { %v37_v13 = vsel %vm16_vm0, %v36_v11, 0.0 }
  0xa0   :  { %v102_v10 = vpop.eup %101 }
  0xa1   :  { %v23_v12 = vsel %vm16_vm0, %v102_v10, 0.0 }
  0xa2   :  { %24 = vadd.xlane.f32.xlu1 %v23_v12 }
  0xa6   :  { %38 = vadd.xlane.f32.xlu1 %v37_v13 }
 0x12f   :  { %v25_v14 = vpop.xlane.xlu1 %24 }
 0x130   :  { %103 = vlog2.f32 %v25_v14 }
 0x133   :  { %v39_v17 = vpop.xlane.xlu1 %38 }
 0x13a   :  { %v104_v15 = vpop.eup %103 }
 0x13b   :  { %v27_v16 = vmul.f32 0.6931472, %v104_v15 }
 0x13d   :  { %v28_v18 = vadd.f32 %v27_v16, %v19_v4 }
 0x13f   :  { %v40_v20 = vsub.f32 %v28_v18, %v39_v17 }
 0x141   :  { %v51_v21 = vmul.f32 %v50_v19, %v40_v20  ;;  %v63_v23 = vsel %vm52_vm2, %v40_v20, 0.0 }
 0x143   :  { %v53_v22 = vsel %vm52_vm2, %v51_v21, 0.0 }
 0x144   :  { %54 = vadd.xlane.f32.xlu1 %v53_v22 }
 0x148   :  { %64 = vadd.xlane.f32.xlu1 %v63_v23 }
 0x1d1   :  { %v55_v24 = vpop.xlane.xlu1 %54 }
 0x1d2   :  { %v56_v25 = vrot.slane %v55_v24, 4 }
 0x1d4   :  { %v57_v26 = vadd.f32 %v56_v25, %v55_v24 }
 0x1d5   :  { %v65_v27 = vpop.xlane.xlu1 %64 }
 0x1d6   :  { %v58_v28 = vrot.slane %v57_v26, 2  ;;  %v66_v29 = vrot.slane %v65_v27, 4 }
 0x1d8   :  { %v67_v30 = vadd.f32 %v66_v29, %v65_v27  ;;  %v59_v31 = vadd.f32 %v58_v28, %v57_v26 }
 0x1da   :  { %v68_v32 = vrot.slane %v67_v30, 2  ;;  %v60_v33 = vrot.slane %v59_v31, 1 }
 0x1dc   :  { %v69_v34 = vadd.f32 %v68_v32, %v67_v30  ;;  %v61_v35 = vadd.f32 %v60_v33, %v59_v31 }
 0x1de   :  { %94 = vpush %v61_v35  ;;  %v70_v36 = vrot.slane %v69_v34, 1 }
 0x1e0   :  { %v71_v37 = vadd.f32 %v70_v36, %v69_v34 }
 0x1e2   :  { %96 = vpush %v71_v37 }
 0x20f   :  { %s95_s2 = spop %94 }
 0x210   :  { %v77_v39 = vstv %s95_s2 }
 0x213   :  { %s97_s18 = spop %96 }
 0x214   :  { %v75_v38 = vstv %s97_s18 }
 0x215   :  { %v76_v40 = vsel %vm74_vm3, %v75_v38, 0.0 }
 0x216   :  { %v78_v41 = vsel %vm73_vm4, %v77_v39, %v76_v40 }
 0x217   :  { %79 = vst [vmem:[#allocation2] sm:$0x1] %v78_v41 }
 0x218   :  { %116 = shalt.err (!%p113_p4)
}
 0x219   :  { %s117_s23 = scalar_lea.hbm %s178_s3, 16 }
 0x21a   :  { %p118_p5 = scmp.ne.s32.totalorder %s178_s3, %s117_s23  ;;  %p121_p6 = scmp.lt.u32.totalorder %s117_s23, %s178_s3 }
 0x21c   :  { %p123_p7 = pnand %p121_p6, %p118_p5 }
 0x21e   :  { %126 = shalt.err (!%p123_p7)
}
 0x21f   :  { %89 = dma.vmem_to_hbm [thread:$0]  %s87_s17, 16, %s178_s3, [#allocation3]  }
 0x220   :  { %127 = dma.done.wait [#allocation3], 16  }
 0x221   :  { %128 = vsyncadd [#allocation3], 4294967280 }
 0x222   :  { %93 = vsyncpa [#allocation3], 1 }

</bundles_post_ra>
